<compile_context>
chip_gen: v7x
topology: tpu7x:2x2x1
jax: 0.10.0
libtpu: 0.0.40
codegen_flags: <defaults>
</compile_context>

<pallas_src>
import jax
import jax.numpy as jnp
from jax.experimental import pallas as pl
from jax.experimental.pallas import tpu as pltpu

_LANE = 128


def _round_up(x, m):
    return (x + m - 1) // m * m


def _matmul_bias_kernel(x_ref, w_ref, b_ref, o_ref, acc_ref):
    """One (tm, tn) output tile: accumulate over the innermost (reduction)
    grid axis in a VMEM f32 scratch; add bias and cast once at the end."""
    k = pl.program_id(2)

    @pl.when(k == 0)
    def _():
        acc_ref[...] = jnp.zeros_like(acc_ref)

    acc_ref[...] += jnp.dot(
        x_ref[...], w_ref[...], preferred_element_type=jnp.float32
    )

    @pl.when(k == pl.num_programs(2) - 1)
    def _():
        # Bias is (1, tn) f32, broadcast once per tile (hoisted, not per tap).
        o_ref[...] = (acc_ref[...] + b_ref[...]).astype(o_ref.dtype)


def _vmem_bytes(tm, tk, tn, in_bytes, out_bytes):
    # double-buffered inputs + double-buffered output + f32 scratch acc + bias
    return (
        2 * (tm * tk + tk * tn) * in_bytes
        + 2 * tm * tn * out_bytes
        + tm * tn * 4
        + 2 * tn * 4
    )


def _pick_tile(dim_pad, candidates):
    for c in candidates:
        if c <= dim_pad and dim_pad % c == 0:
            return c
    return _LANE


def conv2d_pallas(x_nchw, weight_oihw, bias, stride=1, compute_dtype=None):
    """Equivalent of nn.Conv2d(in, out, k, stride=1, padding=k//2, bias=True).

    compute_dtype: dtype for the matmul operands (e.g. jnp.bfloat16 for MXU
    peak on v5e/v6e/v7x). Accumulation is always f32; output keeps x's dtype.
    """
    # TODO(synk): stride > 1 not implemented (module default is stride=1).
    assert stride == 1
    N, Cin, H, W = x_nchw.shape
    Cout, Cin_w, K, K2 = weight_oihw.shape
    assert Cin_w == Cin and K == K2
    p = K // 2

    out_dtype = x_nchw.dtype
    if compute_dtype is None:
        compute_dtype = x_nchw.dtype

    # ---- im2col in plain JAX (layout glue, not the hot loop) ----
    x_nhwc = jnp.transpose(x_nchw, (0, 2, 3, 1)).astype(compute_dtype)
    x_pad = jnp.pad(x_nhwc, ((0, 0), (p, p), (p, p), (0, 0)))
    patches = []
    for kh in range(K):
        for kw in range(K):
            patches.append(x_pad[:, kh:kh + H, kw:kw + W, :])  # (N, H, W, Cin)
    M = N * H * W
    Kd = K * K * Cin
    x_col = jnp.concatenate(patches, axis=-1).reshape(M, Kd)

    # Weight (O,I,Kh,Kw) -> (Kh,Kw,I,O) -> (K*K*Cin, Cout); matches patch order.
    w_col = (
        jnp.transpose(weight_oihw, (2, 3, 1, 0))
        .reshape(Kd, Cout)
        .astype(compute_dtype)
    )
    b_col = bias.reshape(1, Cout).astype(jnp.float32)

    # ---- pad every dim to a multiple of 128 (full MXU, unmasked stores) ----
    Cout_pad = _round_up(Cout, _LANE)
    Kd_pad = _round_up(Kd, _LANE)

    # ---- generation-keyed tile sizing against physical VMEM ----
    try:
        vmem_phys = pltpu.get_tpu_info().vmem_capacity_bytes
    except Exception:
        vmem_phys = 64 << 20  # conservative: v7x per-TC VMEM
    vmem_budget = int(vmem_phys * 0.7)  # leave ~30% headroom for the compiler

    in_sz = jnp.dtype(compute_dtype).itemsize
    out_sz = jnp.dtype(out_dtype).itemsize

    tn = _pick_tile(Cout_pad, (256, 128))
    tk = _pick_tile(Kd_pad, (512, 256, 128))
    tm = min(1024, _round_up(M, _LANE))
    while tm > 128 and _vmem_bytes(tm, tk, tn, in_sz, out_sz) > vmem_budget:
        tm //= 2
    M_pad = _round_up(M, tm)

    x_col = jnp.pad(x_col, ((0, M_pad - M), (0, Kd_pad - Kd)))
    w_col = jnp.pad(w_col, ((0, Kd_pad - Kd), (0, Cout_pad - Cout)))
    b_col = jnp.pad(b_col, ((0, 0), (0, Cout_pad - Cout)))

    grid = (M_pad // tm, Cout_pad // tn, Kd_pad // tk)

    grid_spec = pltpu.PrefetchScalarGridSpec(
        num_scalar_prefetch=0,
        grid=grid,
        in_specs=[
            pl.BlockSpec((tm, tk), lambda i, j, k: (i, k)),   # patches
            pl.BlockSpec((tk, tn), lambda i, j, k: (k, j)),   # weight
            pl.BlockSpec((1, tn), lambda i, j, k: (0, j)),    # bias
        ],
        out_specs=pl.BlockSpec((tm, tn), lambda i, j, k: (i, j)),
        scratch_shapes=[pltpu.VMEM((tm, tn), jnp.float32)],
    )

    out_flat = pl.pallas_call(
        _matmul_bias_kernel,
        out_shape=jax.ShapeDtypeStruct((M_pad, Cout_pad), out_dtype),
        grid_spec=grid_spec,
        compiler_params=pltpu.CompilerParams(
            # row / col tiles are independent -> megacore sharding on v7x;
            # contraction axis is a reduction -> arbitrary.
            dimension_semantics=("parallel", "parallel", "arbitrary"),
            vmem_limit_bytes=vmem_budget,
        ),
    )(x_col, w_col, b_col)

    out_nhwc = out_flat[:M, :Cout].reshape(N, H, W, Cout)
    return jnp.transpose(out_nhwc, (0, 3, 1, 2))  # back to NCHW


def init_conv_params(key, in_channel, out_channel, kernel_size):
    """Matches _conv.__init__: weight ~ N(0, 0.02), bias = 0."""
    w = 0.02 * jax.random.normal(
        key, (out_channel, in_channel, kernel_size, kernel_size), jnp.float32
    )
    b = jnp.zeros((out_channel,), jnp.float32)
    return w, b


if __name__ == "__main__":
    key = jax.random.PRNGKey(0)
    k_x, k_w = jax.random.split(key)

    # Small shapes consistent with the module's forward (NCHW input).
    N, Cin, H, W = 2, 4, 16, 16
    Cout, K = 8, 3

    x = jax.random.normal(k_x, (N, Cin, H, W), jnp.float32)
    weight, bias = init_conv_params(k_w, Cin, Cout, K)

    # XLA conv reference.
    ref = jax.lax.conv_general_dilated(
        x, weight, window_strides=(1, 1),
        padding=((K // 2, K // 2), (K // 2, K // 2)),
        dimension_numbers=("NCHW", "OIHW", "NCHW"),
    ) + bias[None, :, None, None]

    # f32 compute path (tight check).
    out = jax.block_until_ready(conv2d_pallas(x, weight, bias))
    assert out.shape == (N, Cout, H, W)
    assert jnp.allclose(out, ref, atol=1e-4, rtol=1e-4)

    # bf16 matmul-input path (f32 accumulation), looser tolerance.
    out_bf16 = jax.block_until_ready(
        conv2d_pallas(x, weight, bias, compute_dtype=jnp.bfloat16)
    )
    assert out_bf16.shape == (N, Cout, H, W)
    assert jnp.allclose(out_bf16, ref, atol=5e-2, rtol=5e-2)

    print("KERNEL_OK")
</pallas_src>

<mosaic_0001>
module attributes {stable_mosaic.version = 11 : i64} {
  func.func @_matmul_bias_kernel(%arg0: i32, %arg1: i32, %arg2: i32, %arg3: memref<512x128xf32, #tpu.memory_space<vmem>>, %arg4: memref<128x128xf32, #tpu.memory_space<vmem>>, %arg5: memref<1x128xf32, #tpu.memory_space<vmem>>, %arg6: memref<512x128xf32, #tpu.memory_space<vmem>>, %arg7: memref<512x128xf32, #tpu.memory_space<vmem>>) attributes {dimension_semantics = [#tpu.dimension_semantics<parallel>, #tpu.dimension_semantics<parallel>, #tpu.dimension_semantics<arbitrary>], iteration_bounds = array<i64: 1, 1, 1>, scalar_prefetch = 0 : i64, scratch_operands = 1 : i64, tpu.core_type = #tpu.core_type<tc>, window_params = [{transform_indices = @transform_0, window_bounds = array<i64: 512, 128>}, {transform_indices = @transform_1, window_bounds = array<i64: 128, 128>}, {transform_indices = @transform_2, window_bounds = array<i64: 1, 128>}, {transform_indices = @transform_3, window_bounds = array<i64: 512, 128>}]} {
    %c0_i32 = arith.constant 0 : i32
    %0 = arith.cmpi eq, %arg2, %c0_i32 : i32
    %1 = arith.extui %0 : i1 to i32
    %c0_i32_0 = arith.constant 0 : i32
    %2 = arith.cmpi ne, %1, %c0_i32_0 : i32
    scf.if %2 {
      %cst_10 = arith.constant 0.000000e+00 : f32
      %12 = vector.broadcast %cst_10 : f32 to vector<512x128xf32>
      %c0_11 = arith.constant 0 : index
      %c0_12 = arith.constant 0 : index
      %13 = vector.load %arg7[%c0_11, %c0_12] : memref<512x128xf32, #tpu.memory_space<vmem>>, vector<512x128xf32>
      tpu.vector_store %arg7[%c0_11, %c0_12], %12 {strides = array<i32>} : memref<512x128xf32, #tpu.memory_space<vmem>>, vector<512x128xf32>,
    } else {
    }
    %c0 = arith.constant 0 : index
    %c0_1 = arith.constant 0 : index
    %3 = vector.load %arg7[%c0, %c0_1] : memref<512x128xf32, #tpu.memory_space<vmem>>, vector<512x128xf32>
    %c0_2 = arith.constant 0 : index
    %c0_3 = arith.constant 0 : index
    %4 = vector.load %arg3[%c0_2, %c0_3] : memref<512x128xf32, #tpu.memory_space<vmem>>, vector<512x128xf32>
    %c0_4 = arith.constant 0 : index
    %c0_5 = arith.constant 0 : index
    %5 = vector.load %arg4[%c0_4, %c0_5] : memref<128x128xf32, #tpu.memory_space<vmem>>, vector<128x128xf32>
    %cst = arith.constant dense<0.000000e+00> : vector<512x128xf32>
    %6 = tpu.matmul %4, %5, %cst {dimension_numbers = #tpu.dot_dimension_numbers<[1], [0], [0], [1], [0, 0, 1, 1], [], []>} : vector<512x128xf32>, vector<128x128xf32>, vector<512x128xf32> -> vector<512x128xf32>
    %7 = arith.addf %3, %6 : vector<512x128xf32>
    %c0_6 = arith.constant 0 : index
    %c0_7 = arith.constant 0 : index
    %8 = vector.load %arg7[%c0_6, %c0_7] : memref<512x128xf32, #tpu.memory_space<vmem>>, vector<512x128xf32>
    tpu.vector_store %arg7[%c0_6, %c0_7], %7 {strides = array<i32>} : memref<512x128xf32, #tpu.memory_space<vmem>>, vector<512x128xf32>,
    %c0_i32_8 = arith.constant 0 : i32
    %9 = arith.cmpi eq, %arg2, %c0_i32_8 : i32
    %10 = arith.extui %9 : i1 to i32
    %c0_i32_9 = arith.constant 0 : i32
    %11 = arith.cmpi ne, %10, %c0_i32_9 : i32
    scf.if %11 {
      %c0_10 = arith.constant 0 : index
      %c0_11 = arith.constant 0 : index
      %12 = vector.load %arg7[%c0_10, %c0_11] : memref<512x128xf32, #tpu.memory_space<vmem>>, vector<512x128xf32>
      %c0_12 = arith.constant 0 : index
      %c0_13 = arith.constant 0 : index
      %13 = vector.load %arg5[%c0_12, %c0_13] : memref<1x128xf32, #tpu.memory_space<vmem>>, vector<1x128xf32>
      %14 = vector.broadcast %13 : vector<1x128xf32> to vector<512x128xf32>
      %15 = arith.addf %12, %14 : vector<512x128xf32>
      %c0_14 = arith.constant 0 : index
      %c0_15 = arith.constant 0 : index
      %16 = vector.load %arg6[%c0_14, %c0_15] : memref<512x128xf32, #tpu.memory_space<vmem>>, vector<512x128xf32>
      tpu.vector_store %arg6[%c0_14, %c0_15], %15 {strides = array<i32>} : memref<512x128xf32, #tpu.memory_space<vmem>>, vector<512x128xf32>,
    } else {
    }
    return
  }
  func.func @transform_0(%arg0: i32, %arg1: i32, %arg2: i32) -> (i32, i32) {
    %c0_i32 = arith.constant 0 : i32
    return %arg0, %arg2 : i32, i32
  }
  func.func @transform_1(%arg0: i32, %arg1: i32, %arg2: i32) -> (i32, i32) {
    %c0_i32 = arith.constant 0 : i32
    return %arg2, %arg1 : i32, i32
  }
  func.func @transform_2(%arg0: i32, %arg1: i32, %arg2: i32) -> (i32, i32) {
    %c0_i32 = arith.constant 0 : i32
    %c0_i32_0 = arith.constant 0 : i32
    return %c0_i32, %arg1 : i32, i32
  }
  func.func @transform_3(%arg0: i32, %arg1: i32, %arg2: i32) -> (i32, i32) {
    %c0_i32 = arith.constant 0 : i32
    return %arg0, %arg1 : i32, i32
  }
}

</mosaic_0001>

<bundles_post_ra>
// kernel: tpu_custom_call.1
= control target key start
LH: loop header
LB: loop body
LE: loop exit
PB: predicated region body
PF: predicated region fallthrough
CT: control target
= control target key end

     0   :  { %8 = vsyncpa [#allocation4], 0  ;;  %s1461_s0 = inlined_call_operand.hbm [shape: f32[512,128], index: 0, kind: input, shape index: {}]   ;;  %s1462_s1 = inlined_call_operand.hbm [shape: f32[128,128], index: 1, kind: input, shape index: {}]   ;;  %s1463_s2 = inlined_call_operand.vmem [shape: f32[1,128], index: 2, kind: input, shape index: {}]   ;;  %s1464_s3 = inlined_call_operand.hbm [shape: f32[512,128], index: 3, kind: output, shape index: {}]  }
   0x1   :  { %9 = vsyncpa [#allocation7], 0 }
   0x2   :  { %10 = vsyncpa [#allocation5], 0  ;;  %s1322_s12 = smov [#allocation3]   ;;  %s1250_s16 = scalar_lea.hbm %s1461_s0, 8192 }
   0x3   :  { %s16_s13 = sshll.u32 %s1322_s12, 4  ;;  %p1251_p0 = scmp.ne.s32.totalorder %s1461_s0, %s1250_s16  ;;  %s17_s13 = int_to_ptr.vmem [resolvable:$true] %s16_s13 }
   0x4   :  { %p1254_p1 = scmp.lt.u32.totalorder %s1250_s16, %s1461_s0 }
   0x6   :  { %p1256_p2 = pnand %p1254_p1, %p1251_p0 }
   0x8   :  { %1259 = shalt.err (!%p1256_p2)
}
   0x9   :  { %s1260_s21 = scalar_lea.vmem %s17_s13, 8192  ;;  %p1265_p4 = scmp.lt.s32.totalorder %s17_s13, %s17_s13 }
   0xa   :  { %p1261_p3 = scmp.ne.s32.totalorder %s17_s13, %s1260_s21  ;;  %p1266_p5 = scmp.lt.s32.totalorder %s1260_s21, %s1260_s21 }
   0xc   :  { %p1267_p6 = por %p1266_p5, %p1265_p4 }
   0xe   :  { %p1268_p7 = pnand %p1267_p6, %p1261_p3 }
  0x10   :  { %1271 = shalt.err (!%p1268_p7)
}
  0x11   :  { %s1323_s22 = smov 128   ;;  %s1324_s23 = smov 8  }
  0x12   :  { %22 = dma.hbm_to_vmem [thread:$0]  %s1461_s0, 8192, %s17_s13, [#allocation4], %s1323_s22, %s1323_s22, %s1324_s23  }
  0x13   :  { %s1325_s26 = smov [#allocation6]   ;;  %s1272_s30 = scalar_lea.hbm %s1462_s1, 2048 }
  0x14   :  { %s28_s27 = sshll.u32 %s1325_s26, 4  ;;  %p1273_p8 = scmp.ne.s32.totalorder %s1462_s1, %s1272_s30  ;;  %s29_s27 = int_to_ptr.vmem [resolvable:$true] %s28_s27 }
  0x15   :  { %p1276_p9 = scmp.lt.u32.totalorder %s1272_s30, %s1462_s1 }
  0x17   :  { %p1278_p10 = pnand %p1276_p9, %p1273_p8 }
  0x19   :  { %1281 = shalt.err (!%p1278_p10)
}
  0x1a   :  { %s1282_s8 = scalar_lea.vmem %s29_s27, 2048  ;;  %p1287_p12 = scmp.lt.s32.totalorder %s29_s27, %s29_s27 }
  0x1b   :  { %p1283_p11 = scmp.ne.s32.totalorder %s29_s27, %s1282_s8  ;;  %p1288_p13 = scmp.lt.s32.totalorder %s1282_s8, %s1282_s8 }
  0x1d   :  { %p1289_p0 = por %p1288_p13, %p1287_p12 }
  0x1f   :  { %p1290_p1 = pnand %p1289_p0, %p1283_p11 }
  0x21   :  { %1293 = shalt.err (!%p1290_p1)
}
  0x22   :  { %34 = dma.hbm_to_vmem [thread:$0]  %s1462_s1, 2048, %s29_s27, [#allocation7], %s1323_s22, %s1323_s22, %s1324_s23  }
  0x23   :  { %1316 = dma.done.wait [#allocation4], 8192  }
  0x24   :  { %1317 = vsyncadd [#allocation4], 4294959104 }
  0x25   :  { %1318 = dma.done.wait [#allocation7], 2048  }
  0x26   :  { %1319 = vsyncadd [#allocation7], 4294965248  ;;  %v239_v0 = vld [vmem:[#allocation6] sm:$0xff]  ;;  %v240_v1 = vld [vmem:[#allocation6 + $0x8] sm:$0xff] }
  0x27   :  { %v241_v2 = vld [vmem:[#allocation6 + $0x10] sm:$0xff]  ;;  %v1197_v3 = vpack.c.bf16 %v240_v1, %v239_v0  ;;  %v242_v4 = vld [vmem:[#allocation6 + $0x18] sm:$0xff]  ;;  %v243_v6 = vld [vmem:[#allocation6 + $0x20] sm:$0xff] }
  0x28   :  { %v1201_v5 = vpack.c.bf16 %v242_v4, %v241_v2  ;;  %v244_v7 = vld [vmem:[#allocation6 + $0x28] sm:$0xff]  ;;  %v175_v9 = vld [vmem:[#allocation3] sm:$0xff]  ;;  %v245_v11 = vld [vmem:[#allocation6 + $0x30] sm:$0xff] }
  0x29   :  { %1198 = vmatprep.subr.bf16.mxu0 %v1197_v3  ;;  %1229 = vmatprep.subr.bf16.mxu1 %v1197_v3  ;;  %v1205_v8 = vpack.c.bf16 %v244_v7, %v243_v6  ;;  %v207_v10 = vld [vmem:[#allocation3 + $0x100] sm:$0xff]  ;;  %v246_v12 = vld [vmem:[#allocation6 + $0x38] sm:$0xff]  ;;  %v248_v15 = vld [vmem:[#allocation6 + $0x48] sm:$0xff] }
  0x2a   :  { %1200 = vmatpush3.bf16.msra.mxu0 %v1197_v3  ;;  %1237 = vmatpush3.bf16.msra.mxu1 %v1197_v3  ;;  %v1209_v13 = vpack.c.bf16 %v246_v12, %v245_v11  ;;  %v247_v14 = vld [vmem:[#allocation6 + $0x40] sm:$0xff]  ;;  %v249_v17 = vld [vmem:[#allocation6 + $0x50] sm:$0xff]  ;;  %v250_v18 = vld [vmem:[#allocation6 + $0x58] sm:$0xff] }
  0x2b   :  { %1202 = vmatprep.subr.bf16.mxu0 %v1201_v5  ;;  %1230 = vmatprep.subr.bf16.mxu1 %v1201_v5  ;;  %v1213_v16 = vpack.c.bf16 %v248_v15, %v247_v14  ;;  %v1217_v19 = vpack.c.bf16 %v250_v18, %v249_v17  ;;  %v251_v20 = vld [vmem:[#allocation6 + $0x60] sm:$0xff]  ;;  %v252_v21 = vld [vmem:[#allocation6 + $0x68] sm:$0xff]  ;;  %v253_v23 = vld [vmem:[#allocation6 + $0x70] sm:$0xff] }
  0x2c   :  { %1101 = vmatprep.mubr.f32.mxu0 %v175_v9  ;;  %1149 = vmatprep.mubr.f32.mxu1 %v207_v10  ;;  %v1221_v22 = vpack.c.bf16 %v252_v21, %v251_v20  ;;  %v254_v24 = vld [vmem:[#allocation6 + $0x78] sm:$0xff]  ;;  %v176_v26 = vld [vmem:[#allocation3 + $0x8] sm:$0xff]  ;;  %v177_v28 = vld [vmem:[#allocation3 + $0x10] sm:$0xff] }
  0x2d   :  { %v1225_v25 = vpack.c.bf16 %v254_v24, %v253_v23  ;;  %v208_v27 = vld [vmem:[#allocation3 + $0x108] sm:$0xff]  ;;  %v209_v29 = vld [vmem:[#allocation3 + $0x110] sm:$0xff]  ;;  %v178_v30 = vld [vmem:[#allocation3 + $0x18] sm:$0xff] }
  0x2e   :  { %1204 = vmatpush3.bf16.msra.mxu0 %v1201_v5  ;;  %1238 = vmatpush3.bf16.msra.mxu1 %v1201_v5  ;;  %v210_v31 = vld [vmem:[#allocation3 + $0x118] sm:$0xff]  ;;  %v179_v32 = vld [vmem:[#allocation3 + $0x20] sm:$0xff]  ;;  %v180_v34 = vld [vmem:[#allocation3 + $0x28] sm:$0xff] }
  0x2f   :  { %1206 = vmatprep.subr.bf16.mxu0 %v1205_v8  ;;  %1231 = vmatprep.subr.bf16.mxu1 %v1205_v8  ;;  %v211_v33 = vld [vmem:[#allocation3 + $0x120] sm:$0xff]  ;;  %v212_v35 = vld [vmem:[#allocation3 + $0x128] sm:$0xff]  ;;  %v181_v36 = vld [vmem:[#allocation3 + $0x30] sm:$0xff] }
  0x30   :  { %v213_v37 = vld [vmem:[#allocation3 + $0x130] sm:$0xff]  ;;  %v182_v38 = vld [vmem:[#allocation3 + $0x38] sm:$0xff]  ;;  %v183_v40 = vld [vmem:[#allocation3 + $0x40] sm:$0xff] }
  0x31   :  { %v214_v39 = vld [vmem:[#allocation3 + $0x138] sm:$0xff]  ;;  %v215_v41 = vld [vmem:[#allocation3 + $0x140] sm:$0xff]  ;;  %v184_v42 = vld [vmem:[#allocation3 + $0x48] sm:$0xff] }
  0x32   :  { %1208 = vmatpush3.bf16.msra.mxu0 %v1205_v8  ;;  %1239 = vmatpush3.bf16.msra.mxu1 %v1205_v8  ;;  %v216_v43 = vld [vmem:[#allocation3 + $0x148] sm:$0xff]  ;;  %v185_v44 = vld [vmem:[#allocation3 + $0x50] sm:$0xff]  ;;  %v186_v46 = vld [vmem:[#allocation3 + $0x58] sm:$0xff] }
  0x33   :  { %1210 = vmatprep.subr.bf16.mxu0 %v1209_v13  ;;  %1232 = vmatprep.subr.bf16.mxu1 %v1209_v13  ;;  %v217_v45 = vld [vmem:[#allocation3 + $0x150] sm:$0xff]  ;;  %v218_v47 = vld [vmem:[#allocation3 + $0x158] sm:$0xff]  ;;  %v187_v48 = vld [vmem:[#allocation3 + $0x60] sm:$0xff] }
  0x34   :  { %v219_v49 = vld [vmem:[#allocation3 + $0x160] sm:$0xff]  ;;  %v188_v50 = vld [vmem:[#allocation3 + $0x68] sm:$0xff]  ;;  %v189_v52 = vld [vmem:[#allocation3 + $0x70] sm:$0xff] }
  0x35   :  { %v220_v51 = vld [vmem:[#allocation3 + $0x168] sm:$0xff]  ;;  %v221_v53 = vld [vmem:[#allocation3 + $0x170] sm:$0xff]  ;;  %v190_v54 = vld [vmem:[#allocation3 + $0x78] sm:$0xff] }
  0x36   :  { %1212 = vmatpush3.bf16.msra.mxu0 %v1209_v13  ;;  %1240 = vmatpush3.bf16.msra.mxu1 %v1209_v13  ;;  %v222_v55 = vld [vmem:[#allocation3 + $0x178] sm:$0xff]  ;;  %v191_v56 = vld [vmem:[#allocation3 + $0x80] sm:$0xff]  ;;  %v192_v58 = vld [vmem:[#allocation3 + $0x88] sm:$0xff] }
  0x37   :  { %1214 = vmatprep.subr.bf16.mxu0 %v1213_v16  ;;  %1233 = vmatprep.subr.bf16.mxu1 %v1213_v16  ;;  %v223_v57 = vld [vmem:[#allocation3 + $0x180] sm:$0xff]  ;;  %v224_v59 = vld [vmem:[#allocation3 + $0x188] sm:$0xff]  ;;  %v193_v60 = vld [vmem:[#allocation3 + $0x90] sm:$0xff] }
  0x38   :  { %v225_v61 = vld [vmem:[#allocation3 + $0x190] sm:$0xff]  ;;  %v194_v62 = vld [vmem:[#allocation3 + $0x98] sm:$0xff]  ;;  %v195_v0 = vld [vmem:[#allocation3 + $0xa0] sm:$0xff] }
  0x39   :  { %v226_v63 = vld [vmem:[#allocation3 + $0x198] sm:$0xff]  ;;  %v227_v1 = vld [vmem:[#allocation3 + $0x1a0] sm:$0xff]  ;;  %v196_v2 = vld [vmem:[#allocation3 + $0xa8] sm:$0xff] }
  0x3a   :  { %1216 = vmatpush3.bf16.msra.mxu0 %v1213_v16  ;;  %1241 = vmatpush3.bf16.msra.mxu1 %v1213_v16  ;;  %v228_v3 = vld [vmem:[#allocation3 + $0x1a8] sm:$0xff]  ;;  %v197_v4 = vld [vmem:[#allocation3 + $0xb0] sm:$0xff]  ;;  %v198_v6 = vld [vmem:[#allocation3 + $0xb8] sm:$0xff] }
  0x3b   :  { %1218 = vmatprep.subr.bf16.mxu0 %v1217_v19  ;;  %1234 = vmatprep.subr.bf16.mxu1 %v1217_v19  ;;  %v229_v5 = vld [vmem:[#allocation3 + $0x1b0] sm:$0xff]  ;;  %v230_v7 = vld [vmem:[#allocation3 + $0x1b8] sm:$0xff]  ;;  %v199_v8 = vld [vmem:[#allocation3 + $0xc0] sm:$0xff] }
  0x3c   :  { %v231_v9 = vld [vmem:[#allocation3 + $0x1c0] sm:$0xff]  ;;  %v200_v10 = vld [vmem:[#allocation3 + $0xc8] sm:$0xff]  ;;  %v201_v12 = vld [vmem:[#allocation3 + $0xd0] sm:$0xff] }
  0x3d   :  { %v232_v11 = vld [vmem:[#allocation3 + $0x1c8] sm:$0xff]  ;;  %v233_v13 = vld [vmem:[#allocation3 + $0x1d0] sm:$0xff]  ;;  %v202_v14 = vld [vmem:[#allocation3 + $0xd8] sm:$0xff] }
  0x3e   :  { %1220 = vmatpush3.bf16.msra.mxu0 %v1217_v19  ;;  %1242 = vmatpush3.bf16.msra.mxu1 %v1217_v19  ;;  %v234_v15 = vld [vmem:[#allocation3 + $0x1d8] sm:$0xff]  ;;  %v203_v16 = vld [vmem:[#allocation3 + $0xe0] sm:$0xff]  ;;  %v204_v18 = vld [vmem:[#allocation3 + $0xe8] sm:$0xff] }
  0x3f   :  { %1222 = vmatprep.subr.bf16.mxu0 %v1221_v22  ;;  %1235 = vmatprep.subr.bf16.mxu1 %v1221_v22  ;;  %v235_v17 = vld [vmem:[#allocation3 + $0x1e0] sm:$0xff]  ;;  %v236_v19 = vld [vmem:[#allocation3 + $0x1e8] sm:$0xff]  ;;  %v205_v20 = vld [vmem:[#allocation3 + $0xf0] sm:$0xff] }
  0x40   :  { %v237_v21 = vld [vmem:[#allocation3 + $0x1f0] sm:$0xff]  ;;  %v238_v23 = vld [vmem:[#allocation3 + $0x1f8] sm:$0xff]  ;;  %v1380_v24 = vld [vmem:[%s1463_s2] ss:$0 sm:$0xff]  ;;  %s1326_s2 = smov [#allocation8]  }
  0x41   :  { %s975_s11 = sshll.u32 %s1326_s2, 4  ;;  %s976_s11 = int_to_ptr.vmem [resolvable:$true] %s975_s11 }
  0x42   :  { %1224 = vmatpush3.bf16.msra.mxu0 %v1221_v22  ;;  %1243 = vmatpush3.bf16.msra.mxu1 %v1221_v22  ;;  %v206_v22 = vld [vmem:[#allocation3 + $0xf8] sm:$0xff]  ;;  %s1294_s12 = scalar_lea.vmem %s976_s11, 8192  ;;  %p1299_p3 = scmp.lt.s32.totalorder %s976_s11, %s976_s11 }
  0x43   :  { %1226 = vmatprep.subr.bf16.mxu0 %v1225_v25  ;;  %1236 = vmatprep.subr.bf16.mxu1 %v1225_v25  ;;  %p1295_p2 = scmp.ne.s32.totalorder %s976_s11, %s1294_s12  ;;  %p1300_p4 = scmp.lt.s32.totalorder %s1294_s12, %s1294_s12 }
  0x45   :  { %p1301_p5 = por %p1300_p4, %p1299_p3 }
  0x46   :  { %1228 = vmatpush3.bf16.msra.mxu0 %v1225_v25  ;;  %1244 = vmatpush3.bf16.msra.mxu1 %v1225_v25 }
  0x47   :  { %p1302_p6 = pnand %p1301_p5, %p1295_p2 }
  0x49   :  { %1102 = vmatmul.mubr.f32.vlgmr.msra.gmra.mrb[0].mxu0 %v176_v26  ;;  %1150 = vmatmul.mubr.f32.vlgmr.msra.gmra.mrb[0].mxu1 %v208_v27 }
  0x4a   :  { %1104 = vmatprep.mubr.f32.mxu0 %v177_v28  ;;  %1152 = vmatprep.mubr.f32.mxu1 %v209_v29 }
  0x4d   :  { %1105 = vmatmul.mubr.f32.gmra.mrb[2].mxu0 %v178_v30  ;;  %1153 = vmatmul.mubr.f32.gmra.mrb[2].mxu1 %v210_v31 }
  0x4e   :  { %1107 = vmatprep.mubr.f32.mxu0 %v179_v32  ;;  %1155 = vmatprep.mubr.f32.mxu1 %v211_v33 }
  0x51   :  { %1108 = vmatmul.mubr.f32.gmra.mrb[4].mxu0 %v180_v34  ;;  %1156 = vmatmul.mubr.f32.gmra.mrb[4].mxu1 %v212_v35 }
  0x52   :  { %1110 = vmatprep.mubr.f32.mxu0 %v181_v36  ;;  %1158 = vmatprep.mubr.f32.mxu1 %v213_v37 }
  0x55   :  { %1111 = vmatmul.mubr.f32.gmra.mrb[6].mxu0 %v182_v38  ;;  %1159 = vmatmul.mubr.f32.gmra.mrb[6].mxu1 %v214_v39 }
  0x56   :  { %1113 = vmatprep.mubr.f32.mxu0 %v183_v40  ;;  %1161 = vmatprep.mubr.f32.mxu1 %v215_v41 }
  0x59   :  { %1114 = vmatmul.mubr.f32.gmra.mrb[8].mxu0 %v184_v42  ;;  %1162 = vmatmul.mubr.f32.gmra.mrb[8].mxu1 %v216_v43 }
  0x5a   :  { %1116 = vmatprep.mubr.f32.mxu0 %v185_v44  ;;  %1164 = vmatprep.mubr.f32.mxu1 %v217_v45 }
  0x5d   :  { %1117 = vmatmul.mubr.f32.gmra.mrb[10].mxu0 %v186_v46  ;;  %1165 = vmatmul.mubr.f32.gmra.mrb[10].mxu1 %v218_v47 }
  0x5e   :  { %1119 = vmatprep.mubr.f32.mxu0 %v187_v48  ;;  %1167 = vmatprep.mubr.f32.mxu1 %v219_v49 }
  0x61   :  { %1120 = vmatmul.mubr.f32.gmra.mrb[12].mxu0 %v188_v50  ;;  %1168 = vmatmul.mubr.f32.gmra.mrb[12].mxu1 %v220_v51 }
  0x62   :  { %1122 = vmatprep.mubr.f32.mxu0 %v189_v52  ;;  %1170 = vmatprep.mubr.f32.mxu1 %v221_v53 }
  0x65   :  { %1123 = vmatmul.mubr.f32.gmra.mrb[14].mxu0 %v190_v54  ;;  %1171 = vmatmul.mubr.f32.gmra.mrb[14].mxu1 %v222_v55 }
  0x66   :  { %1125 = vmatprep.mubr.f32.mxu0 %v191_v56  ;;  %1173 = vmatprep.mubr.f32.mxu1 %v223_v57 }
  0x69   :  { %1126 = vmatmul.mubr.f32.gmra.mrb[16].mxu0 %v192_v58  ;;  %1174 = vmatmul.mubr.f32.gmra.mrb[16].mxu1 %v224_v59 }
  0x6a   :  { %1128 = vmatprep.mubr.f32.mxu0 %v193_v60  ;;  %1176 = vmatprep.mubr.f32.mxu1 %v225_v61 }
  0x6d   :  { %1129 = vmatmul.mubr.f32.gmra.mrb[18].mxu0 %v194_v62  ;;  %1177 = vmatmul.mubr.f32.gmra.mrb[18].mxu1 %v226_v63 }
  0x6e   :  { %1131 = vmatprep.mubr.f32.mxu0 %v195_v0  ;;  %1179 = vmatprep.mubr.f32.mxu1 %v227_v1 }
  0x71   :  { %1132 = vmatmul.mubr.f32.gmra.mrb[20].mxu0 %v196_v2  ;;  %1180 = vmatmul.mubr.f32.gmra.mrb[20].mxu1 %v228_v3 }
  0x72   :  { %1134 = vmatprep.mubr.f32.mxu0 %v197_v4  ;;  %1182 = vmatprep.mubr.f32.mxu1 %v229_v5 }
  0x75   :  { %1135 = vmatmul.mubr.f32.gmra.mrb[22].mxu0 %v198_v6  ;;  %1183 = vmatmul.mubr.f32.gmra.mrb[22].mxu1 %v230_v7 }
  0x76   :  { %1137 = vmatprep.mubr.f32.mxu0 %v199_v8  ;;  %1185 = vmatprep.mubr.f32.mxu1 %v231_v9 }
  0x79   :  { %1138 = vmatmul.mubr.f32.gmra.mrb[24].mxu0 %v200_v10  ;;  %1186 = vmatmul.mubr.f32.gmra.mrb[24].mxu1 %v232_v11 }
  0x7a   :  { %1140 = vmatprep.mubr.f32.mxu0 %v201_v12  ;;  %1188 = vmatprep.mubr.f32.mxu1 %v233_v13 }
  0x7d   :  { %1141 = vmatmul.mubr.f32.gmra.mrb[26].mxu0 %v202_v14  ;;  %1189 = vmatmul.mubr.f32.gmra.mrb[26].mxu1 %v234_v15 }
  0x7e   :  { %1143 = vmatprep.mubr.f32.mxu0 %v203_v16  ;;  %1191 = vmatprep.mubr.f32.mxu1 %v235_v17 }
  0x81   :  { %1144 = vmatmul.mubr.f32.gmra.mrb[28].mxu0 %v204_v18  ;;  %1192 = vmatmul.mubr.f32.gmra.mrb[28].mxu1 %v236_v19 }
  0x82   :  { %1146 = vmatprep.mubr.f32.mxu0 %v205_v20  ;;  %1194 = vmatprep.mubr.f32.mxu1 %v237_v21 }
  0x85   :  { %1147 = vmatmul.mubr.f32.gmra.mrb[30].mxu0 %v206_v22  ;;  %1195 = vmatmul.mubr.f32.gmra.mrb[30].mxu1 %v238_v23 }
 0x11c   :  { %v1103_v25 = vpop.f32.mrb[0].mxu0  ;;  %v1151_v26 = vpop.f32.mrb[0].mxu1 }
 0x11d   :  { %v843_v27 = vadd.f32 %v1103_v25, %v1380_v24  ;;  %v875_v28 = vadd.f32 %v1151_v26, %v1380_v24  ;;  %v321_v29 = vpop.f32.mrb[1].mxu0  ;;  %v481_v30 = vpop.f32.mrb[1].mxu1 }
 0x11e   :  { %v842_v31 = vadd.f32 %v1380_v24, %v321_v29  ;;  %v874_v32 = vadd.f32 %v1380_v24, %v481_v30 }
 0x11f   :  { %907 = vst [vmem:[#allocation8 + $0x8] sm:$0xff] %v843_v27  ;;  %939 = vst [vmem:[#allocation8 + $0x108] sm:$0xff] %v875_v28 }
 0x120   :  { %906 = vst [vmem:[#allocation8] sm:$0xff] %v842_v31  ;;  %938 = vst [vmem:[#allocation8 + $0x100] sm:$0xff] %v874_v32  ;;  %v1106_v33 = vpop.f32.mrb[2].mxu0  ;;  %v1154_v34 = vpop.f32.mrb[2].mxu1 }
 0x121   :  { %v845_v35 = vadd.f32 %v1106_v33, %v1380_v24  ;;  %v877_v36 = vadd.f32 %v1154_v34, %v1380_v24  ;;  %v331_v37 = vpop.f32.mrb[3].mxu0  ;;  %v491_v38 = vpop.f32.mrb[3].mxu1 }
 0x122   :  { %v844_v39 = vadd.f32 %v1380_v24, %v331_v37  ;;  %v876_v40 = vadd.f32 %v1380_v24, %v491_v38 }
 0x123   :  { %909 = vst [vmem:[#allocation8 + $0x18] sm:$0xff] %v845_v35  ;;  %941 = vst [vmem:[#allocation8 + $0x118] sm:$0xff] %v877_v36 }
 0x124   :  { %908 = vst [vmem:[#allocation8 + $0x10] sm:$0xff] %v844_v39  ;;  %940 = vst [vmem:[#allocation8 + $0x110] sm:$0xff] %v876_v40  ;;  %v1109_v41 = vpop.f32.mrb[4].mxu0  ;;  %v1157_v42 = vpop.f32.mrb[4].mxu1 }
 0x125   :  { %v847_v43 = vadd.f32 %v1109_v41, %v1380_v24  ;;  %v879_v44 = vadd.f32 %v1157_v42, %v1380_v24  ;;  %v341_v45 = vpop.f32.mrb[5].mxu0  ;;  %v501_v46 = vpop.f32.mrb[5].mxu1 }
 0x126   :  { %v846_v47 = vadd.f32 %v1380_v24, %v341_v45  ;;  %v878_v48 = vadd.f32 %v1380_v24, %v501_v46 }
 0x127   :  { %911 = vst [vmem:[#allocation8 + $0x28] sm:$0xff] %v847_v43  ;;  %943 = vst [vmem:[#allocation8 + $0x128] sm:$0xff] %v879_v44 }
 0x128   :  { %910 = vst [vmem:[#allocation8 + $0x20] sm:$0xff] %v846_v47  ;;  %942 = vst [vmem:[#allocation8 + $0x120] sm:$0xff] %v878_v48  ;;  %v1112_v49 = vpop.f32.mrb[6].mxu0  ;;  %v1160_v50 = vpop.f32.mrb[6].mxu1 }
 0x129   :  { %v849_v51 = vadd.f32 %v1112_v49, %v1380_v24  ;;  %v881_v52 = vadd.f32 %v1160_v50, %v1380_v24  ;;  %v351_v53 = vpop.f32.mrb[7].mxu0  ;;  %v511_v54 = vpop.f32.mrb[7].mxu1 }
 0x12a   :  { %v848_v55 = vadd.f32 %v1380_v24, %v351_v53  ;;  %v880_v56 = vadd.f32 %v1380_v24, %v511_v54 }
 0x12b   :  { %913 = vst [vmem:[#allocation8 + $0x38] sm:$0xff] %v849_v51  ;;  %945 = vst [vmem:[#allocation8 + $0x138] sm:$0xff] %v881_v52 }
 0x12c   :  { %912 = vst [vmem:[#allocation8 + $0x30] sm:$0xff] %v848_v55  ;;  %944 = vst [vmem:[#allocation8 + $0x130] sm:$0xff] %v880_v56  ;;  %v1115_v57 = vpop.f32.mrb[8].mxu0  ;;  %v1163_v58 = vpop.f32.mrb[8].mxu1 }
 0x12d   :  { %v851_v59 = vadd.f32 %v1115_v57, %v1380_v24  ;;  %v883_v60 = vadd.f32 %v1163_v58, %v1380_v24  ;;  %v361_v61 = vpop.f32.mrb[9].mxu0  ;;  %v521_v62 = vpop.f32.mrb[9].mxu1 }
 0x12e   :  { %v850_v63 = vadd.f32 %v1380_v24, %v361_v61  ;;  %v882_v0 = vadd.f32 %v1380_v24, %v521_v62 }
 0x12f   :  { %915 = vst [vmem:[#allocation8 + $0x48] sm:$0xff] %v851_v59  ;;  %947 = vst [vmem:[#allocation8 + $0x148] sm:$0xff] %v883_v60 }
 0x130   :  { %914 = vst [vmem:[#allocation8 + $0x40] sm:$0xff] %v850_v63  ;;  %946 = vst [vmem:[#allocation8 + $0x140] sm:$0xff] %v882_v0  ;;  %v1118_v1 = vpop.f32.mrb[10].mxu0  ;;  %v1166_v2 = vpop.f32.mrb[10].mxu1 }
 0x131   :  { %v853_v3 = vadd.f32 %v1118_v1, %v1380_v24  ;;  %v885_v4 = vadd.f32 %v1166_v2, %v1380_v24  ;;  %v371_v5 = vpop.f32.mrb[11].mxu0  ;;  %v531_v6 = vpop.f32.mrb[11].mxu1 }
 0x132   :  { %v852_v7 = vadd.f32 %v1380_v24, %v371_v5  ;;  %v884_v8 = vadd.f32 %v1380_v24, %v531_v6 }
 0x133   :  { %917 = vst [vmem:[#allocation8 + $0x58] sm:$0xff] %v853_v3  ;;  %949 = vst [vmem:[#allocation8 + $0x158] sm:$0xff] %v885_v4 }
 0x134   :  { %916 = vst [vmem:[#allocation8 + $0x50] sm:$0xff] %v852_v7  ;;  %948 = vst [vmem:[#allocation8 + $0x150] sm:$0xff] %v884_v8  ;;  %v1121_v9 = vpop.f32.mrb[12].mxu0  ;;  %v1169_v10 = vpop.f32.mrb[12].mxu1 }
 0x135   :  { %v855_v11 = vadd.f32 %v1121_v9, %v1380_v24  ;;  %v887_v12 = vadd.f32 %v1169_v10, %v1380_v24  ;;  %v381_v13 = vpop.f32.mrb[13].mxu0  ;;  %v541_v14 = vpop.f32.mrb[13].mxu1 }
 0x136   :  { %v854_v15 = vadd.f32 %v1380_v24, %v381_v13  ;;  %v886_v16 = vadd.f32 %v1380_v24, %v541_v14 }
 0x137   :  { %919 = vst [vmem:[#allocation8 + $0x68] sm:$0xff] %v855_v11  ;;  %951 = vst [vmem:[#allocation8 + $0x168] sm:$0xff] %v887_v12 }
 0x138   :  { %918 = vst [vmem:[#allocation8 + $0x60] sm:$0xff] %v854_v15  ;;  %950 = vst [vmem:[#allocation8 + $0x160] sm:$0xff] %v886_v16  ;;  %v1124_v17 = vpop.f32.mrb[14].mxu0  ;;  %v1172_v18 = vpop.f32.mrb[14].mxu1 }
 0x139   :  { %v857_v19 = vadd.f32 %v1124_v17, %v1380_v24  ;;  %v889_v20 = vadd.f32 %v1172_v18, %v1380_v24  ;;  %v391_v21 = vpop.f32.mrb[15].mxu0  ;;  %v551_v22 = vpop.f32.mrb[15].mxu1 }
 0x13a   :  { %v856_v23 = vadd.f32 %v1380_v24, %v391_v21  ;;  %v888_v25 = vadd.f32 %v1380_v24, %v551_v22 }
 0x13b   :  { %921 = vst [vmem:[#allocation8 + $0x78] sm:$0xff] %v857_v19  ;;  %953 = vst [vmem:[#allocation8 + $0x178] sm:$0xff] %v889_v20 }
 0x13c   :  { %920 = vst [vmem:[#allocation8 + $0x70] sm:$0xff] %v856_v23  ;;  %952 = vst [vmem:[#allocation8 + $0x170] sm:$0xff] %v888_v25  ;;  %v1127_v26 = vpop.f32.mrb[16].mxu0  ;;  %v1175_v27 = vpop.f32.mrb[16].mxu1 }
 0x13d   :  { %v859_v28 = vadd.f32 %v1127_v26, %v1380_v24  ;;  %v891_v29 = vadd.f32 %v1175_v27, %v1380_v24  ;;  %v401_v30 = vpop.f32.mrb[17].mxu0  ;;  %v561_v31 = vpop.f32.mrb[17].mxu1 }
 0x13e   :  { %v858_v32 = vadd.f32 %v1380_v24, %v401_v30  ;;  %v890_v33 = vadd.f32 %v1380_v24, %v561_v31 }
 0x13f   :  { %923 = vst [vmem:[#allocation8 + $0x88] sm:$0xff] %v859_v28  ;;  %955 = vst [vmem:[#allocation8 + $0x188] sm:$0xff] %v891_v29 }
 0x140   :  { %922 = vst [vmem:[#allocation8 + $0x80] sm:$0xff] %v858_v32  ;;  %954 = vst [vmem:[#allocation8 + $0x180] sm:$0xff] %v890_v33  ;;  %v1130_v34 = vpop.f32.mrb[18].mxu0  ;;  %v1178_v35 = vpop.f32.mrb[18].mxu1 }
 0x141   :  { %v861_v36 = vadd.f32 %v1130_v34, %v1380_v24  ;;  %v893_v37 = vadd.f32 %v1178_v35, %v1380_v24  ;;  %v411_v38 = vpop.f32.mrb[19].mxu0  ;;  %v571_v39 = vpop.f32.mrb[19].mxu1 }
 0x142   :  { %v860_v40 = vadd.f32 %v1380_v24, %v411_v38  ;;  %v892_v41 = vadd.f32 %v1380_v24, %v571_v39 }
 0x143   :  { %925 = vst [vmem:[#allocation8 + $0x98] sm:$0xff] %v861_v36  ;;  %957 = vst [vmem:[#allocation8 + $0x198] sm:$0xff] %v893_v37 }
 0x144   :  { %924 = vst [vmem:[#allocation8 + $0x90] sm:$0xff] %v860_v40  ;;  %956 = vst [vmem:[#allocation8 + $0x190] sm:$0xff] %v892_v41  ;;  %v1133_v42 = vpop.f32.mrb[20].mxu0  ;;  %v1181_v43 = vpop.f32.mrb[20].mxu1 }
 0x145   :  { %v863_v44 = vadd.f32 %v1133_v42, %v1380_v24  ;;  %v895_v45 = vadd.f32 %v1181_v43, %v1380_v24  ;;  %v421_v46 = vpop.f32.mrb[21].mxu0  ;;  %v581_v47 = vpop.f32.mrb[21].mxu1 }
 0x146   :  { %v862_v48 = vadd.f32 %v1380_v24, %v421_v46  ;;  %v894_v49 = vadd.f32 %v1380_v24, %v581_v47 }
 0x147   :  { %927 = vst [vmem:[#allocation8 + $0xa8] sm:$0xff] %v863_v44  ;;  %959 = vst [vmem:[#allocation8 + $0x1a8] sm:$0xff] %v895_v45 }
 0x148   :  { %926 = vst [vmem:[#allocation8 + $0xa0] sm:$0xff] %v862_v48  ;;  %958 = vst [vmem:[#allocation8 + $0x1a0] sm:$0xff] %v894_v49  ;;  %v1136_v50 = vpop.f32.mrb[22].mxu0  ;;  %v1184_v51 = vpop.f32.mrb[22].mxu1 }
 0x149   :  { %v865_v52 = vadd.f32 %v1136_v50, %v1380_v24  ;;  %v897_v53 = vadd.f32 %v1184_v51, %v1380_v24  ;;  %v431_v54 = vpop.f32.mrb[23].mxu0  ;;  %v591_v55 = vpop.f32.mrb[23].mxu1 }
 0x14a   :  { %v864_v56 = vadd.f32 %v1380_v24, %v431_v54  ;;  %v896_v57 = vadd.f32 %v1380_v24, %v591_v55 }
 0x14b   :  { %929 = vst [vmem:[#allocation8 + $0xb8] sm:$0xff] %v865_v52  ;;  %961 = vst [vmem:[#allocation8 + $0x1b8] sm:$0xff] %v897_v53 }
 0x14c   :  { %928 = vst [vmem:[#allocation8 + $0xb0] sm:$0xff] %v864_v56  ;;  %960 = vst [vmem:[#allocation8 + $0x1b0] sm:$0xff] %v896_v57  ;;  %v1139_v58 = vpop.f32.mrb[24].mxu0  ;;  %v1187_v59 = vpop.f32.mrb[24].mxu1 }
 0x14d   :  { %v867_v60 = vadd.f32 %v1139_v58, %v1380_v24  ;;  %v899_v61 = vadd.f32 %v1187_v59, %v1380_v24  ;;  %v441_v62 = vpop.f32.mrb[25].mxu0  ;;  %v601_v63 = vpop.f32.mrb[25].mxu1 }
 0x14e   :  { %v866_v0 = vadd.f32 %v1380_v24, %v441_v62  ;;  %v898_v1 = vadd.f32 %v1380_v24, %v601_v63 }
 0x14f   :  { %931 = vst [vmem:[#allocation8 + $0xc8] sm:$0xff] %v867_v60  ;;  %963 = vst [vmem:[#allocation8 + $0x1c8] sm:$0xff] %v899_v61 }
 0x150   :  { %930 = vst [vmem:[#allocation8 + $0xc0] sm:$0xff] %v866_v0  ;;  %962 = vst [vmem:[#allocation8 + $0x1c0] sm:$0xff] %v898_v1  ;;  %v1142_v2 = vpop.f32.mrb[26].mxu0  ;;  %v1190_v3 = vpop.f32.mrb[26].mxu1 }
 0x151   :  { %v869_v4 = vadd.f32 %v1142_v2, %v1380_v24  ;;  %v901_v5 = vadd.f32 %v1190_v3, %v1380_v24  ;;  %v451_v6 = vpop.f32.mrb[27].mxu0  ;;  %v611_v7 = vpop.f32.mrb[27].mxu1 }
 0x152   :  { %v868_v8 = vadd.f32 %v1380_v24, %v451_v6  ;;  %v900_v9 = vadd.f32 %v1380_v24, %v611_v7 }
 0x153   :  { %933 = vst [vmem:[#allocation8 + $0xd8] sm:$0xff] %v869_v4  ;;  %965 = vst [vmem:[#allocation8 + $0x1d8] sm:$0xff] %v901_v5 }
 0x154   :  { %932 = vst [vmem:[#allocation8 + $0xd0] sm:$0xff] %v868_v8  ;;  %964 = vst [vmem:[#allocation8 + $0x1d0] sm:$0xff] %v900_v9  ;;  %v1145_v10 = vpop.f32.mrb[28].mxu0  ;;  %v1193_v11 = vpop.f32.mrb[28].mxu1 }
 0x155   :  { %v871_v12 = vadd.f32 %v1145_v10, %v1380_v24  ;;  %v903_v13 = vadd.f32 %v1193_v11, %v1380_v24  ;;  %v461_v14 = vpop.f32.mrb[29].mxu0  ;;  %v621_v15 = vpop.f32.mrb[29].mxu1 }
 0x156   :  { %v870_v16 = vadd.f32 %v1380_v24, %v461_v14  ;;  %v902_v17 = vadd.f32 %v1380_v24, %v621_v15 }
 0x157   :  { %935 = vst [vmem:[#allocation8 + $0xe8] sm:$0xff] %v871_v12  ;;  %967 = vst [vmem:[#allocation8 + $0x1e8] sm:$0xff] %v903_v13 }
 0x158   :  { %934 = vst [vmem:[#allocation8 + $0xe0] sm:$0xff] %v870_v16  ;;  %966 = vst [vmem:[#allocation8 + $0x1e0] sm:$0xff] %v902_v17  ;;  %v1148_v18 = vpop.f32.mrb[30].mxu0  ;;  %v1196_v19 = vpop.f32.mrb[30].mxu1 }
 0x159   :  { %v873_v20 = vadd.f32 %v1148_v18, %v1380_v24  ;;  %v905_v21 = vadd.f32 %v1196_v19, %v1380_v24  ;;  %v471_v22 = vpop.f32.mrb[31].mxu0  ;;  %v631_v23 = vpop.f32.mrb[31].mxu1 }
 0x15a   :  { %v872_v25 = vadd.f32 %v1380_v24, %v471_v22  ;;  %v904_v26 = vadd.f32 %v1380_v24, %v631_v23 }
 0x15b   :  { %937 = vst [vmem:[#allocation8 + $0xf8] sm:$0xff] %v873_v20  ;;  %969 = vst [vmem:[#allocation8 + $0x1f8] sm:$0xff] %v905_v21 }
 0x15c   :  { %936 = vst [vmem:[#allocation8 + $0xf0] sm:$0xff] %v872_v25  ;;  %968 = vst [vmem:[#allocation8 + $0x1f0] sm:$0xff] %v904_v26 }
 0x15d   :  { %1305 = shalt.err (!%p1302_p6)
}
 0x15e   :  { %s1306_s15 = scalar_lea.hbm %s1464_s3, 8192 }
 0x15f   :  { %p1307_p7 = scmp.ne.s32.totalorder %s1464_s3, %s1306_s15  ;;  %p1310_p8 = scmp.lt.u32.totalorder %s1306_s15, %s1464_s3 }
 0x161   :  { %p1312_p9 = pnand %p1310_p8, %p1307_p7 }
 0x163   :  { %1315 = shalt.err (!%p1312_p9)
}
 0x164   :  { %981 = dma.vmem_to_hbm [thread:$0]  %s976_s11, 8192, %s1464_s3, [#allocation5], %s1323_s22, %s1323_s22, %s1324_s23  }
 0x165   :  { %1320 = dma.done.wait [#allocation5], 8192  }
 0x166   :  { %1321 = vsyncadd [#allocation5], 4294959104 }
 0x167   :  { %985 = vsyncpa [#allocation4], 1 }
 0x168   :  { %986 = vsyncpa [#allocation7], 1 }
 0x169   :  { %987 = vsyncpa [#allocation5], 1 }

</bundles_post_ra>
